<compile_context>
chip_gen: v7x
topology: tpu7x:2x2x1
jax: 0.10.0
libtpu: 0.0.40
codegen_flags: <defaults>
</compile_context>

<pallas_src>
import functools

import jax
import jax.numpy as jnp
from jax.experimental import pallas as pl
from jax.experimental.pallas import tpu as pltpu


def adagn_kernel(x_ref, emb_ref, ws_ref, aff_ref, o_ref, *,
                 eps, inv_n, hw, frames):
    # x_ref:   (1, Cg, S)   one group's activation slab (S = F*H*W, lane axis)
    # emb_ref: (1, F, E)    per-batch embedding
    # ws_ref:  (Cg, E)      this group's rows of the y_scale weight
    # aff_ref: (Cg, 3)      packed [b_scale, gamma, beta] columns
    # o_ref:   (1, Cg, S)
    x = x_ref[0]                                              # (Cg, S)

    # ---- GroupNorm statistics (two-pass, whole group is this block) --------
    mean = jnp.sum(x) * inv_n                                 # scalar
    xc = x - mean                                             # (Cg, S)
    var = jnp.sum(xc * xc) * inv_n
    rstd = jax.lax.rsqrt(var + eps)                           # EUP slot

    aff = aff_ref[...]                                        # (Cg, 3)
    b_s = aff[:, 0:1]                                         # (Cg, 1) linear bias
    gamma = aff[:, 1:2]                                       # (Cg, 1)
    beta = aff[:, 2:3]                                        # (Cg, 1)

    # fold GroupNorm affine and the "+ shift(==scale)" term:
    #   out = scale * (x_gn + 1) = scale * (xc*a_c + (beta + 1))
    a_c = rstd * gamma                                        # (Cg, 1)
    b_c = beta + 1.0                                          # (Cg, 1)
    x_mod = xc * a_c + b_c                                    # (Cg, S) one FMA/elem

    # ---- per-frame modulation (replaces the torch frame loop) --------------
    # scale_t[c, f] = W_scale[c, :] . emb[f, :] + b_scale[c]
    emb = emb_ref[0]                                          # (F, E)
    scale_t = jax.lax.dot_general(
        ws_ref[...], emb, (((1,), (1,)), ((), ())),
        preferred_element_type=jnp.float32) + b_s             # (Cg, F)

    # apply frame f's per-channel scale to that frame's contiguous H*W lanes;
    # frames is a small static int, so this unrolls (no (Cg,S) scale temp).
    for f in range(frames):
        lo = f * hw
        o_ref[0, :, lo:lo + hw] = (
            scale_t[:, f:f + 1] * x_mod[:, lo:lo + hw]).astype(o_ref.dtype)


def adagn_forward(x, emb, w_scale, b_scale, gamma, beta, *, groups, eps=1e-5):
    """x: (N, C, F, H, W) f32;  emb: (N, F, E) f32.
    w_scale: (C, E) (PyTorch Linear layout); b_scale/gamma/beta: (C,)-like."""
    N, C, Fd, H, W = x.shape
    _, F_emb, E = emb.shape
    assert F_emb == Fd, "emb sequence length must equal the frame dim of x"
    assert C % groups == 0
    Cg = C // groups
    # f32 tiling: the (1, Cg, S) block needs Cg % 8 == 0 once C is tiled.
    # TODO(synk): pad channels (or fall back to a whole-C block) when Cg % 8 != 0.
    assert Cg % 8 == 0, "channels-per-group must be a multiple of 8 (f32 tiling)"
    HW = H * W
    S = Fd * HW

    xs = x.reshape(N, C, S)                                   # lane-dense slab
    affine = jnp.concatenate(
        [jnp.reshape(b_scale, (C, 1)),
         jnp.reshape(gamma, (C, 1)),
         jnp.reshape(beta, (C, 1))], axis=1)                  # (C, 3)

    kern = functools.partial(adagn_kernel, eps=eps, inv_n=1.0 / float(Cg * S),
                             hw=HW, frames=Fd)

    # per-step working set: x tile + out tile (double buffered) + f32 temps.
    tile_bytes = Cg * S * 4
    vmem_limit = int(min(64 * 1024 * 1024, max(16 * 1024 * 1024, 10 * tile_bytes)))

    out = pl.pallas_call(
        kern,
        out_shape=jax.ShapeDtypeStruct((N, C, S), x.dtype),
        grid_spec=pltpu.PrefetchScalarGridSpec(
            num_scalar_prefetch=0,
            grid=(N, groups),
            in_specs=[
                pl.BlockSpec((1, Cg, S), lambda n, g: (n, g, 0)),   # x group slab
                pl.BlockSpec((1, Fd, E), lambda n, g: (n, 0, 0)),   # emb
                pl.BlockSpec((Cg, E), lambda n, g: (g, 0)),         # W_scale rows
                pl.BlockSpec((Cg, 3), lambda n, g: (g, 0)),         # [b_s, gamma, beta]
            ],
            out_specs=pl.BlockSpec((1, Cg, S), lambda n, g: (n, g, 0)),
        ),
        compiler_params=pltpu.CompilerParams(
            dimension_semantics=("parallel", "parallel"),
            vmem_limit_bytes=vmem_limit),
    )(xs, emb, w_scale, affine)

    return out.reshape(N, C, Fd, H, W)


def reference_forward(x, emb, w_scale, b_scale, gamma, beta, *, groups, eps=1e-5):
    """Pure-JAX replica of the PyTorch forward (correctness check)."""
    N, C, Fd, H, W = x.shape
    Cg = C // groups
    xg = x.reshape(N, groups, Cg, Fd, H, W)
    mean = xg.mean(axis=(2, 3, 4, 5), keepdims=True)
    var = ((xg - mean) ** 2).mean(axis=(2, 3, 4, 5), keepdims=True)
    x_hat = ((xg - mean) / jnp.sqrt(var + eps)).reshape(N, C, Fd, H, W)
    x_gn = x_hat * gamma.reshape(1, C, 1, 1, 1) + beta.reshape(1, C, 1, 1, 1)
    # scale[n, f, c] = emb[n, f] @ W_scale^T + b_scale  (shift uses the SAME Linear)
    scale = jnp.einsum('nfe,ce->nfc', emb, w_scale) + b_scale.reshape(1, 1, C)
    scale = jnp.transpose(scale, (0, 2, 1))[:, :, :, None, None]  # (N, C, F, 1, 1)
    return scale * x_gn + scale


if __name__ == "__main__":
    # Small shapes consistent with the module: N=2, C=32, groups=4 (Cg=8),
    # F=4 frames, H=W=16 (HW=256 lane-aligned, S=1024), emb_dim=32.
    N, C, Fd, H, W = 2, 32, 4, 16, 16
    E = 32
    groups = 4

    key = jax.random.PRNGKey(0)
    kx, ke, kw, kb, kg, kbt = jax.random.split(key, 6)

    x = jax.random.normal(kx, (N, C, Fd, H, W), dtype=jnp.float32)
    emb = jax.random.normal(ke, (N, Fd, E), dtype=jnp.float32)

    # PyTorch Linear init: U(-1/sqrt(fan_in), 1/sqrt(fan_in)).
    bound = 1.0 / (E ** 0.5)
    w_scale = jax.random.uniform(kw, (C, E), jnp.float32, -bound, bound)
    b_scale = jax.random.uniform(kb, (C,), jnp.float32, -bound, bound)
    # GroupNorm affine (default init is 1/0; perturbed here to exercise the path).
    gamma = 1.0 + 0.1 * jax.random.normal(kg, (C,), dtype=jnp.float32)
    beta = 0.1 * jax.random.normal(kbt, (C,), dtype=jnp.float32)

    out = adagn_forward(x, emb, w_scale, b_scale, gamma, beta, groups=groups)
    out = jax.block_until_ready(out)

    ref = reference_forward(x, emb, w_scale, b_scale, gamma, beta, groups=groups)
    assert out.shape == (N, C, Fd, H, W)
    assert jnp.allclose(out, ref, atol=1e-4, rtol=1e-4), "mismatch vs reference"

    print("KERNEL_OK")
</pallas_src>

<mosaic_0001>
module attributes {stable_mosaic.version = 11 : i64} {
  func.func @adagn_kernel(%arg0: i32, %arg1: i32, %arg2: memref<1x8x1024xf32, #tpu.memory_space<vmem>>, %arg3: memref<1x4x32xf32, #tpu.memory_space<vmem>>, %arg4: memref<8x32xf32, #tpu.memory_space<vmem>>, %arg5: memref<8x3xf32, #tpu.memory_space<vmem>>, %arg6: memref<1x8x1024xf32, #tpu.memory_space<vmem>>) attributes {dimension_semantics = [#tpu.dimension_semantics<parallel>, #tpu.dimension_semantics<parallel>], iteration_bounds = array<i64: 2, 4>, scalar_prefetch = 0 : i64, scratch_operands = 0 : i64, tpu.core_type = #tpu.core_type<tc>, window_params = [{transform_indices = @transform_0, window_bounds = array<i64: 1, 8, 1024>}, {transform_indices = @transform_1, window_bounds = array<i64: 1, 4, 32>}, {transform_indices = @transform_2, window_bounds = array<i64: 8, 32>}, {transform_indices = @transform_3, window_bounds = array<i64: 8, 3>}, {transform_indices = @transform_4, window_bounds = array<i64: 1, 8, 1024>}]} {
    %c0 = arith.constant 0 : index
    %c0_0 = arith.constant 0 : index
    %c0_1 = arith.constant 0 : index
    %0 = vector.load %arg2[%c0, %c0_0, %c0_1] : memref<1x8x1024xf32, #tpu.memory_space<vmem>>, vector<1x8x1024xf32>
    %1 = vector.shape_cast %0 : vector<1x8x1024xf32> to vector<8x1024xf32>
    %2 = vector.shape_cast %1 : vector<8x1024xf32> to vector<1x8x1024xf32>
    %cst = arith.constant dense<0.000000e+00> : vector<1xf32>
    %3 = vector.multi_reduction <add>, %2, %cst [1, 2] : vector<1x8x1024xf32> to vector<1xf32>
    %4 = vector.shape_cast %3 : vector<1xf32> to vector<1x1x1xf32>
    %5 = vector.extract %4[0, 0, 0] : f32 from vector<1x1x1xf32>
    %cst_2 = arith.constant 1.22070313E-4 : f32
    %6 = arith.mulf %5, %cst_2 : f32
    %7 = vector.broadcast %6 : f32 to vector<8x1024xf32>
    %8 = arith.subf %1, %7 : vector<8x1024xf32>
    %9 = arith.mulf %8, %8 : vector<8x1024xf32>
    %10 = vector.shape_cast %9 : vector<8x1024xf32> to vector<1x8x1024xf32>
    %cst_3 = arith.constant dense<0.000000e+00> : vector<1xf32>
    %11 = vector.multi_reduction <add>, %10, %cst_3 [1, 2] : vector<1x8x1024xf32> to vector<1xf32>
    %12 = vector.shape_cast %11 : vector<1xf32> to vector<1x1x1xf32>
    %13 = vector.extract %12[0, 0, 0] : f32 from vector<1x1x1xf32>
    %cst_4 = arith.constant 1.22070313E-4 : f32
    %14 = arith.mulf %13, %cst_4 : f32
    %cst_5 = arith.constant 9.99999974E-6 : f32
    %15 = arith.addf %14, %cst_5 : f32
    %16 = math.rsqrt %15 : f32
    %c0_6 = arith.constant 0 : index
    %c0_7 = arith.constant 0 : index
    %17 = vector.load %arg5[%c0_6, %c0_7] : memref<8x3xf32, #tpu.memory_space<vmem>>, vector<8x3xf32>
    %18 = vector.extract_strided_slice %17 {offsets = [0, 0], sizes = [8, 1], strides = [1, 1]} : vector<8x3xf32> to vector<8x1xf32>
    %19 = vector.extract_strided_slice %17 {offsets = [0, 1], sizes = [8, 1], strides = [1, 1]} : vector<8x3xf32> to vector<8x1xf32>
    %20 = vector.extract_strided_slice %17 {offsets = [0, 2], sizes = [8, 1], strides = [1, 1]} : vector<8x3xf32> to vector<8x1xf32>
    %21 = vector.broadcast %16 : f32 to vector<8x1xf32>
    %22 = arith.mulf %21, %19 : vector<8x1xf32>
    %cst_8 = arith.constant 1.000000e+00 : f32
    %23 = vector.broadcast %cst_8 : f32 to vector<8x1xf32>
    %24 = arith.addf %20, %23 : vector<8x1xf32>
    %25 = vector.broadcast %22 : vector<8x1xf32> to vector<8x1024xf32>
    %26 = arith.mulf %8, %25 : vector<8x1024xf32>
    %27 = vector.broadcast %24 : vector<8x1xf32> to vector<8x1024xf32>
    %28 = arith.addf %26, %27 : vector<8x1024xf32>
    %c0_9 = arith.constant 0 : index
    %c0_10 = arith.constant 0 : index
    %c0_11 = arith.constant 0 : index
    %29 = vector.load %arg3[%c0_9, %c0_10, %c0_11] : memref<1x4x32xf32, #tpu.memory_space<vmem>>, vector<1x4x32xf32>
    %30 = vector.shape_cast %29 : vector<1x4x32xf32> to vector<4x32xf32>
    %c0_12 = arith.constant 0 : index
    %c0_13 = arith.constant 0 : index
    %31 = vector.load %arg4[%c0_12, %c0_13] : memref<8x32xf32, #tpu.memory_space<vmem>>, vector<8x32xf32>
    %cst_14 = arith.constant dense<0.000000e+00> : vector<8x4xf32>
    %32 = tpu.matmul %31, %30, %cst_14 {dimension_numbers = #tpu.dot_dimension_numbers<[1], [1], [0], [0], [0, 0, 1, 0], [], []>} : vector<8x32xf32>, vector<4x32xf32>, vector<8x4xf32> -> vector<8x4xf32>
    %33 = vector.broadcast %18 : vector<8x1xf32> to vector<8x4xf32>
    %34 = arith.addf %32, %33 : vector<8x4xf32>
    %35 = vector.extract_strided_slice %34 {offsets = [0, 0], sizes = [8, 1], strides = [1, 1]} : vector<8x4xf32> to vector<8x1xf32>
    %36 = vector.extract_strided_slice %28 {offsets = [0, 0], sizes = [8, 256], strides = [1, 1]} : vector<8x1024xf32> to vector<8x256xf32>
    %37 = vector.broadcast %35 : vector<8x1xf32> to vector<8x256xf32>
    %38 = arith.mulf %37, %36 : vector<8x256xf32>
    %c0_15 = arith.constant 0 : index
    %c0_16 = arith.constant 0 : index
    %c0_17 = arith.constant 0 : index
    %39 = vector.load %arg6[%c0_15, %c0_16, %c0_17] : memref<1x8x1024xf32, #tpu.memory_space<vmem>>, vector<1x8x256xf32>
    %40 = vector.shape_cast %39 : vector<1x8x256xf32> to vector<8x256xf32>
    %41 = vector.shape_cast %38 : vector<8x256xf32> to vector<1x8x256xf32>
    tpu.vector_store %arg6[%c0_15, %c0_16, %c0_17], %41 {strides = array<i32>} : memref<1x8x1024xf32, #tpu.memory_space<vmem>>, vector<1x8x256xf32>,
    %42 = vector.extract_strided_slice %34 {offsets = [0, 1], sizes = [8, 1], strides = [1, 1]} : vector<8x4xf32> to vector<8x1xf32>
    %43 = vector.extract_strided_slice %28 {offsets = [0, 256], sizes = [8, 256], strides = [1, 1]} : vector<8x1024xf32> to vector<8x256xf32>
    %44 = vector.broadcast %42 : vector<8x1xf32> to vector<8x256xf32>
    %45 = arith.mulf %44, %43 : vector<8x256xf32>
    %c0_18 = arith.constant 0 : index
    %c0_19 = arith.constant 0 : index
    %c256 = arith.constant 256 : index
    %46 = vector.load %arg6[%c0_18, %c0_19, %c256] : memref<1x8x1024xf32, #tpu.memory_space<vmem>>, vector<1x8x256xf32>
    %47 = vector.shape_cast %46 : vector<1x8x256xf32> to vector<8x256xf32>
    %48 = vector.shape_cast %45 : vector<8x256xf32> to vector<1x8x256xf32>
    tpu.vector_store %arg6[%c0_18, %c0_19, %c256], %48 {strides = array<i32>} : memref<1x8x1024xf32, #tpu.memory_space<vmem>>, vector<1x8x256xf32>,
    %49 = vector.extract_strided_slice %34 {offsets = [0, 2], sizes = [8, 1], strides = [1, 1]} : vector<8x4xf32> to vector<8x1xf32>
    %50 = vector.extract_strided_slice %28 {offsets = [0, 512], sizes = [8, 256], strides = [1, 1]} : vector<8x1024xf32> to vector<8x256xf32>
    %51 = vector.broadcast %49 : vector<8x1xf32> to vector<8x256xf32>
    %52 = arith.mulf %51, %50 : vector<8x256xf32>
    %c0_20 = arith.constant 0 : index
    %c0_21 = arith.constant 0 : index
    %c512 = arith.constant 512 : index
    %53 = vector.load %arg6[%c0_20, %c0_21, %c512] : memref<1x8x1024xf32, #tpu.memory_space<vmem>>, vector<1x8x256xf32>
    %54 = vector.shape_cast %53 : vector<1x8x256xf32> to vector<8x256xf32>
    %55 = vector.shape_cast %52 : vector<8x256xf32> to vector<1x8x256xf32>
    tpu.vector_store %arg6[%c0_20, %c0_21, %c512], %55 {strides = array<i32>} : memref<1x8x1024xf32, #tpu.memory_space<vmem>>, vector<1x8x256xf32>,
    %56 = vector.extract_strided_slice %34 {offsets = [0, 3], sizes = [8, 1], strides = [1, 1]} : vector<8x4xf32> to vector<8x1xf32>
    %57 = vector.extract_strided_slice %28 {offsets = [0, 768], sizes = [8, 256], strides = [1, 1]} : vector<8x1024xf32> to vector<8x256xf32>
    %58 = vector.broadcast %56 : vector<8x1xf32> to vector<8x256xf32>
    %59 = arith.mulf %58, %57 : vector<8x256xf32>
    %c0_22 = arith.constant 0 : index
    %c0_23 = arith.constant 0 : index
    %c768 = arith.constant 768 : index
    %60 = vector.load %arg6[%c0_22, %c0_23, %c768] : memref<1x8x1024xf32, #tpu.memory_space<vmem>>, vector<1x8x256xf32>
    %61 = vector.shape_cast %60 : vector<1x8x256xf32> to vector<8x256xf32>
    %62 = vector.shape_cast %59 : vector<8x256xf32> to vector<1x8x256xf32>
    tpu.vector_store %arg6[%c0_22, %c0_23, %c768], %62 {strides = array<i32>} : memref<1x8x1024xf32, #tpu.memory_space<vmem>>, vector<1x8x256xf32>,
    return
  }
  func.func @transform_0(%arg0: i32, %arg1: i32) -> (i32, i32, i32) {
    %c0_i32 = arith.constant 0 : i32
    %c0_i32_0 = arith.constant 0 : i32
    return %arg0, %arg1, %c0_i32 : i32, i32, i32
  }
  func.func @transform_1(%arg0: i32, %arg1: i32) -> (i32, i32, i32) {
    %c0_i32 = arith.constant 0 : i32
    %c0_i32_0 = arith.constant 0 : i32
    %c0_i32_1 = arith.constant 0 : i32
    return %arg0, %c0_i32, %c0_i32_0 : i32, i32, i32
  }
  func.func @transform_2(%arg0: i32, %arg1: i32) -> (i32, i32) {
    %c0_i32 = arith.constant 0 : i32
    %c0_i32_0 = arith.constant 0 : i32
    return %arg1, %c0_i32 : i32, i32
  }
  func.func @transform_3(%arg0: i32, %arg1: i32) -> (i32, i32) {
    %c0_i32 = arith.constant 0 : i32
    %c0_i32_0 = arith.constant 0 : i32
    return %arg1, %c0_i32 : i32, i32
  }
  func.func @transform_4(%arg0: i32, %arg1: i32) -> (i32, i32, i32) {
    %c0_i32 = arith.constant 0 : i32
    %c0_i32_0 = arith.constant 0 : i32
    return %arg0, %arg1, %c0_i32 : i32, i32, i32
  }
}

</mosaic_0001>

<bundles_post_ra>
// kernel: tpu_custom_call.1
= control target key start
LH: loop header
LB: loop body
LE: loop exit
PB: predicated region body
PF: predicated region fallthrough
CT: control target
= control target key end

     0   :  { %9 = vsyncpa [#allocation3], 0  ;;  %s1178_s0 = inlined_call_operand.hbm [shape: f32[2,32,1024], index: 0, kind: input, shape index: {}]   ;;  %s1179_s1 = inlined_call_operand.vmem [shape: f32[2,4,32], index: 1, kind: input, shape index: {}]   ;;  %s1180_s2 = inlined_call_operand.vmem [shape: f32[32,32], index: 2, kind: input, shape index: {}]   ;;  %s1181_s3 = inlined_call_operand.vmem [shape: f32[32,3], index: 3, kind: input, shape index: {}]   ;;  %s1182_s4 = inlined_call_operand.hbm [shape: f32[2,32,1024], index: 4, kind: output, shape index: {}]  }
   0x1   :  { %11 = vsyncpa [#allocation3 + $0x1], 0 }
   0x2   :  { %12 = vsyncpa [#allocation4], 0 }
   0x3   :  { %14 = vsyncpa [#allocation4 + $0x1], 0  ;;  %s924_s15 = smov 0   ;;  %s926_s16 = smov 0  }
   0x4   :  { %s928_s17 = smov 0   ;;  %s930_s18 = smov 0  }
   0x5   :  { %s932_s19 = smov 0   ;;  %s934_s20 = smov 0  }
   0x6   :  { %s936_s21 = smov 0   ;;  %s938_s22 = smov 0  }
   0x7 LB: > { %s633_s23 = sadd.s32 4294967295, %s889_s22   ;;  %s634_s24 = sadd.s32 4294967294, %s889_s22   ;;  %s889_s22 = sphi %s938_s22, %s20_s22   ;;  %s885_s21 = sphi %s936_s21, %s1202_s21   ;;  %s881_s20 = sphi %s934_s20, %s1201_s20   ;;  %s877_s19 = sphi %s932_s19, %s1200_s19   ;;  %s873_s18 = sphi %s930_s18, %s1199_s18   ;;  %s869_s17 = sphi %s928_s17, %s1198_s17   ;;  %s865_s16 = sphi %s926_s16, %s1197_s16   ;;  %s861_s15 = sphi %s924_s15, %s1196_s15  }
   0x8   : > { %s29_s25 = sadd.s32 1, %s881_s20  ;;  %s32_s26 = sadd.s32 1, %s885_s21 }
   0x9   : > { %p30_p0 = scmp.ge.s32.totalorder %s29_s25, 4  ;;  %s41_s27 = sadd.s32 1, %s869_s17 }
   0xa   : > { %p48_p1 = scmp.ne.s32.totalorder %s869_s17, %s865_s16  ;;  %p49_p2 = scmp.eq.s32.totalorder %s889_s22, 0 }
   0xb   : > { %s1204_s25 = smov (%p30_p0, %s29_s25), 0  ;;  %s1206_s26 = smov (!%p30_p0, %s32_s26), %s885_s21 }
   0xc   : > { %s37_s28 = ssub.s32 %s881_s20, %s1204_s25  ;;  %p977_p3 = por %p49_p2, %p48_p1 }
   0xd   : > { %p34_p4 = scmp.ge.s32.totalorder %s1206_s26, 2  ;;  %p54_p5 = scmp.ne.s32.totalorder %s865_s16, %s861_s15 }
   0xe   : > { %p55_p6 = scmp.eq.s32.totalorder %s633_s23, 0  ;;  %p158_p7 = scmp.eq.s32.totalorder %s633_s23, 7 }
   0xf   : > { %s1208_s26 = smov (%p34_p4, %s1206_s26), 0  ;;  %p164_p10 = scmp.eq.s32.totalorder %s634_s24, 7 }
  0x10   : > { %1186 = sst [smem:[#allocation8_spill]] %s1208_s26  ;;  %p985_p8 = por %p55_p6, %p54_p5 }
  0x11   : > { %p989_p9 = por %p158_p7, %p48_p1  ;;  %s36_s6 = ssub.s32 %s885_s21, %s1208_s26 }
  0x12   : > { %s38_s7 = sor.u32 %s37_s28, %s36_s6  ;;  %p995_p12 = por %p164_p10, %p54_p5 }
  0x13   : > { %s1188_s5 = scalar_select %p989_p9, 1, 0 }
  0x14   : > { %p39_p11 = scmp.eq.s32.totalorder %s38_s7, 0  ;;  %p680_p13 = scmp.lt.s32.totalorder %s889_s22, 8 }
  0x15   : > { %s1189_s8 = scalar_select %p995_p12, 1, 0 }
  0x16   : > { %s184_s9 = sand.u32 1, %s869_s17   ;;  %s638_s12 = sshll.u32 %s881_s20, 3 }
  0x17   : > { %s1002_s10 = scalar_select %p39_p11, %s869_s17, %s41_s27  }
  0x18   : > { %s637_s11 = sshll.u32 %s184_s9, 6  ;;  %s639_s13 = sshll.u32 %s885_s21, 5 }
  0x19   : > { %s188_s14 = scalar_lea.vmem [#allocation2], %s637_s11  ;;  %s194_s26 = sadd.s32 %s639_s13, %s638_s12 }
  0x1a   : > { %s198_s23 = sshll.u32 %s188_s14, 4  ;;  %s640_s24 = sshll.u32 %s194_s26, 7  ;;  %s1006_s23 = int_to_ptr.vmem [resolvable:$true] %s198_s23 }
  0x1b   : > { %p1010_p0 = pnand %p680_p13, %p977_p3  ;;  %s1017_s27 = scalar_lea.hbm %s1178_s0, %s640_s24 }
  0x1c   : > { %s185_s11 = scalar_lea.sflag [#allocation3], %s184_s9  ;;  %s761_s26 = scalar_lea.hbm %s1017_s27, 1024 }
  0x1d   : > { %p762_p4 = scmp.ne.s32.totalorder %s1017_s27, %s761_s26  ;;  %p763_p3 = pneg %p1010_p0 }
  0x1e   : > { %s766_s13 = scalar_lea.hbm %s1178_s0, 8192  ;;  %p767_p7 = scmp.lt.u32.totalorder %s1017_s27, %s1178_s0 }
  0x1f   : > { %p764_p5 = pnand %p763_p3, %p762_p4  ;;  %p768_p10 = scmp.lt.u32.totalorder %s766_s13, %s761_s26 }
  0x20   : > { %p770_p13 = scmp.lt.u32.totalorder %s761_s26, %s1017_s27 }
  0x21   : > { %p765_p6 = pneg %p764_p5  ;;  %p769_p11 = por %p768_p10, %p767_p7 }
  0x23   : > { %p771_p1 = por %p770_p13, %p769_p11 }
  0x25   : > { %p772_p2 = pnand %p771_p1, %p765_p6 }
  0x27   : > { %775 = shalt.err (!%p772_p2)
}
  0x28   : > { %s776_s9 = scalar_lea.vmem %s1006_s23, 1024  ;;  %s891_s6 = smov [#allocation2]  }
  0x29   : > { %p777_p4 = scmp.ne.s32.totalorder %s1006_s23, %s776_s9  ;;  %s781_s7 = sshll.u32 %s891_s6, 4  ;;  %s782_s7 = int_to_ptr.vmem [resolvable:$false] %s781_s7 }
  0x2a   : > { %s783_s29 = scalar_lea.vmem %s782_s7, 2048  ;;  %p784_p9 = scmp.lt.s32.totalorder %s1006_s23, %s782_s7 }
  0x2b   : > { %p779_p5 = pnand %p777_p4, %p763_p3  ;;  %p785_p7 = scmp.lt.s32.totalorder %s783_s29, %s776_s9 }
  0x2d   : > { %p780_p12 = pneg %p779_p5  ;;  %p786_p10 = por %p785_p7, %p784_p9 }
  0x2f   : > { %p787_p11 = pnand %p786_p10, %p780_p12 }
  0x31   : > { %790 = shalt.err (!%p787_p11)
}
  0x32   : > { %675 = dma.hbm_to_vmem [thread:$0]  (!%p1010_p0), %s1017_s27, 1024, %s1006_s23, %s185_s11  }
  0x33   : > { %p1191_p1 = scmp.lt.s32.totalorder %s889_s22, 9  ;;  %p1192_p2 = scmp.ge.s32.totalorder %s889_s22, 1 }
  0x35   : > { %p225_p3 = pnand %p1192_p2, %p1191_p1 }
  0x36   : > { %s1051_s26 = sand.u32 (!%p225_p3), 1, %s865_s16  }
  0x37   : > { %228 = sbr.rel (%p225_p3) target bundleno = 728 (0x2d8), region = 36  ;;  %s642_s12 = sshll.u32 (!%p225_p3), %s1051_s26, 6 }
  0x38   : > { %s231_s13 = scalar_lea.sflag (!%p225_p3), [#allocation3], %s1051_s26  ;;  %s1057_s28 = scalar_lea.vmem (!%p225_p3), [#allocation2], %s642_s12 }
  0x3e   : > { %852 = dma.done.wait (%p985_p8), %s231_s13, 1024  }
  0x3f   : > { %854 = vsyncadd (%p985_p8), %s231_s13, 4294966272  ;;  %p271_p9 = scmp.lt.s32.totalorder %s877_s19, 1  ;;  %p275_p12 = scmp.lt.s32.totalorder %s873_s18, 3  ;;  %v892_v0 = vmov 0.0   ;;  %vm893_vm0 = vmmov 0   ;;  %v283_v1 = vld [vmem:[%s1057_s28] sm:$0xff] }
  0x40   : > { %657 = vmatprep.subr.mxu0 %v892_v0  ;;  %659 = vmatprep.mubr.msk.f32.mxu0 %vm893_vm0, %v892_v0  ;;  %v284_v2 = vld [vmem:[%s1057_s28 + $0x8] sm:$0xff]  ;;  %v285_v3 = vld [vmem:[%s1057_s28 + $0x10] sm:$0xff]  ;;  %vm383_vm1 = vcmask 261120   ;;  %v286_v5 = vld [vmem:[%s1057_s28 + $0x18] sm:$0xff]  ;;  %v894_v18 = vmov 0   ;;  %v895_v55 = vmov 1  }
  0x41   : > { %s272_s23 = scalar_select %p271_p9, %s877_s19, 1  ;;  %v291_v4 = vadd.f32 %v284_v2, %v283_v1  ;;  %v287_v9 = vld [vmem:[%s1057_s28 + $0x20] sm:$0xff]  ;;  %v288_v11 = vld [vmem:[%s1057_s28 + $0x28] sm:$0xff]  ;;  %v289_v13 = vld [vmem:[%s1057_s28 + $0x30] sm:$0xff]  ;;  %752 = vset.pattern.permute.xlu1 %v894_v18  ;;  %v896_v56 = vmov 2   ;;  %v897_v0 = vmov 3  }
  0x42   : > { %s276_s27 = scalar_select %p275_p12, %s873_s18, 3  ;;  %v290_v15 = vld [vmem:[%s1057_s28 + $0x38] sm:$0xff]  ;;  %753 = vset.pattern.permute.xlu0 %v896_v56 }
  0x43   : > { %s644_s11 = sshll.u32 %s272_s23, 2  ;;  %v292_v7 = vadd.f32 %v291_v4, %v285_v3  ;;  %s650_s6 = sshll.u32 %s873_s18, 3 }
  0x44   : > { %s645_s30 = sshll.u32 %s276_s27, 3  ;;  %s274_s9 = scalar_lea.vmem %s1179_s1, %s644_s11 }
  0x45   : > { %s278_s29 = scalar_lea.vmem %s1180_s2, %s645_s30  ;;  %v376_v6 = vld [vmem:[%s274_s9] sm:$0xf]  ;;  %v293_v10 = vadd.f32 %v292_v7, %v286_v5  ;;  %s282_s27 = scalar_lea.vmem %s1181_s3, %s645_s30 }
  0x46   : > { %658 = vmatpush3.xpose.msk.msra.mxu0 %vm383_vm1, %v376_v6  ;;  %v377_v8 = vld [vmem:[%s278_s29] sm:$0xff]  ;;  %s651_s7 = sshll.u32 %s877_s19, 5  ;;  %s270_s19 = scalar_lea.vmem [#allocation5], %s642_s12 }
  0x47   : > { %v294_v12 = vadd.f32 %v293_v10, %v287_v9  ;;  %v1084_v19 = vld [vmem:[%s282_s27] sm:$0xff]  ;;  %s1111_s29 = sadd.s32 %s651_s7, %s650_s6  ;;  %s510_s13 = sshll.u32 %s270_s19, 4  ;;  %s1126_s13 = int_to_ptr.vmem [resolvable:$true] %s510_s13 }
  0x48   : > { %380 = vperm.xlu1 %752, %v1084_v19   ;;  %v349_v60 = vadd.f32 1.0, %v1084_v19  ;;  %s652_s18 = sshll.u32 %s1111_s29, 7  ;;  %p1193_p0 = scmp.ne.s32.totalorder %s1188_s5, 0 }
  0x49   : > { %660 = vmatmul.mubr.msk.f32.vlgmr.msra.gmra.mrb[0].mxu0 %vm383_vm1, %v377_v8  ;;  %v295_v14 = vadd.f32 %v294_v12, %v288_v11  ;;  %s1124_s12 = scalar_lea.hbm %s1182_s4, %s652_s18 }
  0x4b   : > { %v296_v16 = vadd.f32 %v295_v14, %v289_v13 }
  0x4d   : > { %v297_v17 = vadd.f32 %v296_v16, %v290_v15 }
  0x4f   : > { %298 = vadd.xlane.f32.xlu0 %v297_v17 }
  0xc7   : > { %v381_v33 = vpop.permute.xlu1 %380 }
  0xdc   : > { %v299_v20 = vpop.xlane.xlu0 %298 }
  0xdd   : > { %v300_v21 = vrot.slane %v299_v20, 4 }
  0xdf   : > { %v301_v22 = vadd.f32 %v300_v21, %v299_v20 }
  0xe1   : > { %v302_v23 = vrot.slane %v301_v22, 2 }
  0xe3   : > { %v303_v24 = vadd.f32 %v302_v23, %v301_v22 }
  0xe5   : > { %v304_v25 = vrot.slane %v303_v24, 1 }
  0xe7   : > { %v305_v26 = vadd.f32 %v304_v25, %v303_v24 }
  0xe9   : > { %662 = vpush %v305_v26 }
 0x11a   : > { %s663_s28 = spop %662 }
 0x11b   : > { %s307_s11 = smul.f32 0.00012207031, %s663_s28  ;;  %s494_s28 = scalar_lea.sflag [#allocation4], %s1051_s26 }
 0x11c   : > { %v456_v27 = vpop.f32.mrb[0].mxu0 }
 0x11d   : > { %v661_v28 = vpop.f32.mrb[1].mxu0  ;;  %v308_v29 = vstv %s307_s11  ;;  %v457_v40 = vadd.f32 %v456_v27, %v381_v33  ;;  %s791_s11 = scalar_lea.vmem %s1126_s13, 1024 }
 0x11e   : > { %v1087_v30 = vsub.f32 %v283_v1, %v308_v29  ;;  %v1089_v31 = vsub.f32 %v284_v2, %v308_v29  ;;  %v1091_v32 = vsub.f32 %v285_v3, %v308_v29  ;;  %v1093_v34 = vsub.f32 %v286_v5, %v308_v29  ;;  %p792_p8 = scmp.ne.s32.totalorder %s1126_s13, %s791_s11 }
 0x11f   : > { %v1099_v37 = vsub.f32 %v287_v9, %v308_v29  ;;  %v314_v41 = vsub.f32 %v288_v11, %v308_v29  ;;  %462 = vperm.xlu1 %752, %v457_v40   ;;  %v315_v44 = vsub.f32 %v289_v13, %v308_v29  ;;  %v316_v47 = vsub.f32 %v290_v15, %v308_v29 }
 0x120   : > { %v317_v35 = vmul.f32 %v1087_v30, %v1087_v30  ;;  %v318_v36 = vmul.f32 %v1089_v31, %v1089_v31  ;;  %v319_v38 = vmul.f32 %v1091_v32, %v1091_v32  ;;  %v320_v42 = vmul.f32 %v1093_v34, %v1093_v34  ;;  %p793_p6 = pnand %p792_p8, %p1193_p0 }
 0x121   : > { %v321_v45 = vmul.f32 %v1099_v37, %v1099_v37  ;;  %v322_v48 = vmul.f32 %v314_v41, %v314_v41  ;;  %v323_v50 = vmul.f32 %v315_v44, %v315_v44  ;;  %v324_v52 = vmul.f32 %v316_v47, %v316_v47 }
 0x122   : > { %v325_v39 = vadd.f32 %v318_v36, %v317_v35  ;;  %p794_p13 = pneg %p793_p6 }
 0x123   : > { %754 = vset.pattern.permute.xlu1 %v895_v55 }
 0x124   : > { %v326_v43 = vadd.f32 %v325_v39, %v319_v38  ;;  %470 = vperm.xlu1 %754, %v457_v40  }
 0x126   : > { %v327_v46 = vadd.f32 %v326_v43, %v320_v42 }
 0x128   : > { %v328_v49 = vadd.f32 %v327_v46, %v321_v45  ;;  %755 = vset.pattern.permute.xlu1 %v896_v56 }
 0x129   : > { %478 = vperm.xlu1 %755, %v457_v40  }
 0x12a   : > { %v329_v51 = vadd.f32 %v328_v49, %v322_v48 }
 0x12c   : > { %v330_v53 = vadd.f32 %v329_v51, %v323_v50 }
 0x12d   : > { %756 = vset.pattern.permute.xlu1 %v895_v55 }
 0x12e   : > { %v331_v54 = vadd.f32 %v330_v53, %v324_v52 }
 0x130   : > { %332 = vadd.xlane.f32.xlu0 %v331_v54 }
 0x146   : > { %365 = vperm.xlu0 %753, %v349_v60  }
 0x14a   : > { %758 = vset.pattern.permute.xlu0 %v897_v0 }
 0x19e   : > { %v463_v6 = vpop.permute.xlu1 %462 }
 0x1a3   : > { %v471_v7 = vpop.permute.xlu1 %470 }
 0x1a8   : > { %v479_v8 = vpop.permute.xlu1 %478 }
 0x1bd   : > { %v333_v57 = vpop.xlane.xlu0 %332 }
 0x1be   : > { %v334_v58 = vrot.slane %v333_v57, 4 }
 0x1c0   : > { %v335_v59 = vadd.f32 %v334_v58, %v333_v57 }
 0x1c2   : > { %v336_v61 = vrot.slane %v335_v59, 2 }
 0x1c4   : > { %v337_v62 = vadd.f32 %v336_v61, %v335_v59 }
 0x1c5   : > { %v366_v10 = vpop.permute.xlu0 %365 }
 0x1c6   : > { %v338_v63 = vrot.slane %v337_v62, 1 }
 0x1c8   : > { %v339_v1 = vadd.f32 %v338_v63, %v337_v62 }
 0x1ca   : > { %664 = vpush %v339_v1 }
 0x1fb   : > { %s665_s30 = spop %664 }
 0x1fc   : > { %s341_s14 = smul.f32 0.00012207031, %s665_s30  ;;  %s898_s30 = smov [#allocation5]  }
 0x1fe   : > { %s342_s24 = sadd.f32 1e-05, %s341_s14  ;;  %s795_s14 = sshll.u32 %s898_s30, 4  ;;  %s796_s14 = int_to_ptr.vmem [resolvable:$false] %s795_s14 }
 0x1ff   : > { %p798_p4 = scmp.lt.s32.totalorder %s1126_s13, %s796_s14 }
 0x200   : > { %v343_v2 = vstv %s342_s24  ;;  %s797_s24 = scalar_lea.vmem %s796_s14, 2048 }
 0x201   : > { %759 = vrsqrt.f32 %v343_v2  ;;  %p799_p5 = scmp.lt.s32.totalorder %s797_s24, %s791_s11 }
 0x203   : > { %p800_p7 = por %p799_p5, %p798_p4 }
 0x205   : > { %p801_p10 = pnand %p800_p7, %p794_p13 }
 0x20b   : > { %v760_v3 = vpop.eup %759 }
 0x20c   : > { %666 = vpush %v760_v3 }
 0x23d   : > { %s667_s9 = spop %666 }
 0x23e   : > { %v347_v4 = vstv %s667_s9 }
 0x23f   : > { %v348_v5 = vmul.f32 %v347_v4, %v1084_v19 }
 0x241   : > { %352 = vperm.xlu1 %756, %v348_v5  }
 0x245   : > { %757 = vset.pattern.permute.xlu1 %v897_v0 }
 0x246   : > { %486 = vperm.xlu1 %757, %v457_v40  }
 0x2c0   : > { %v353_v9 = vpop.permute.xlu1 %352 }
 0x2c1   : > { %v355_v11 = vmul.f32 %v353_v9, %v1087_v30  ;;  %v356_v12 = vmul.f32 %v353_v9, %v1089_v31  ;;  %v357_v13 = vmul.f32 %v353_v9, %v1091_v32  ;;  %v358_v14 = vmul.f32 %v353_v9, %v1093_v34 }
 0x2c2   : > { %v359_v15 = vmul.f32 %v353_v9, %v1099_v37  ;;  %v360_v16 = vmul.f32 %v353_v9, %v314_v41  ;;  %v361_v17 = vmul.f32 %v353_v9, %v315_v44  ;;  %v362_v18 = vmul.f32 %v353_v9, %v316_v47 }
 0x2c3   : > { %v368_v19 = vadd.f32 %v366_v10, %v355_v11  ;;  %v369_v20 = vadd.f32 %v366_v10, %v356_v12  ;;  %v370_v21 = vadd.f32 %v366_v10, %v357_v13  ;;  %v371_v22 = vadd.f32 %v366_v10, %v358_v14 }
 0x2c4   : > { %v372_v23 = vadd.f32 %v366_v10, %v359_v15  ;;  %v373_v24 = vadd.f32 %v366_v10, %v360_v16  ;;  %v374_v25 = vadd.f32 %v366_v10, %v361_v17  ;;  %v375_v26 = vadd.f32 %v366_v10, %v362_v18 }
 0x2c5   : > { %v465_v27 = vmul.f32 %v463_v6, %v368_v19  ;;  %v466_v28 = vmul.f32 %v463_v6, %v369_v20  ;;  %v473_v29 = vmul.f32 %v471_v7, %v370_v21  ;;  %v474_v30 = vmul.f32 %v471_v7, %v371_v22  ;;  %v487_v31 = vpop.permute.xlu1 %486 }
 0x2c6   : > { %v481_v32 = vmul.f32 %v479_v8, %v372_v23  ;;  %v482_v33 = vmul.f32 %v479_v8, %v373_v24  ;;  %v489_v34 = vmul.f32 %v487_v31, %v374_v25  ;;  %v490_v35 = vmul.f32 %v487_v31, %v375_v26 }
 0x2c7   : > { %467 = vst [vmem:[%s270_s19] sm:$0xff] %v465_v27  ;;  %468 = vst [vmem:[%s270_s19 + $0x8] sm:$0xff] %v466_v28 }
 0x2c8   : > { %475 = vst [vmem:[%s270_s19 + $0x10] sm:$0xff] %v473_v29  ;;  %476 = vst [vmem:[%s270_s19 + $0x18] sm:$0xff] %v474_v30 }
 0x2c9   : > { %483 = vst [vmem:[%s270_s19 + $0x20] sm:$0xff] %v481_v32  ;;  %484 = vst [vmem:[%s270_s19 + $0x28] sm:$0xff] %v482_v33 }
 0x2ca   : > { %491 = vst [vmem:[%s270_s19 + $0x30] sm:$0xff] %v489_v34  ;;  %492 = vst [vmem:[%s270_s19 + $0x38] sm:$0xff] %v490_v35 }
 0x2cb   : > { %804 = shalt.err (!%p801_p10)
}
 0x2cc   : > { %s805_s26 = scalar_lea.hbm %s1124_s12, 1024  ;;  %s809_s7 = scalar_lea.hbm %s1182_s4, 8192 }
 0x2cd   : > { %p806_p11 = scmp.ne.s32.totalorder %s1124_s12, %s805_s26  ;;  %p810_p3 = scmp.lt.u32.totalorder %s1124_s12, %s1182_s4 }
 0x2ce   : > { %p811_p9 = scmp.lt.u32.totalorder %s809_s7, %s805_s26  ;;  %p813_p8 = scmp.lt.u32.totalorder %s805_s26, %s1124_s12 }
 0x2cf   : > { %p807_p1 = pnand %p806_p11, %p1193_p0 }
 0x2d0   : > { %p812_p12 = por %p811_p9, %p810_p3 }
 0x2d1   : > { %p808_p2 = pneg %p807_p1 }
 0x2d2   : > { %p814_p6 = por %p813_p8, %p812_p12 }
 0x2d4   : > { %p815_p13 = pnand %p814_p6, %p808_p2 }
 0x2d6   : > { %818 = shalt.err (!%p815_p13)
}
 0x2d7   : > { %670 = dma.vmem_to_hbm [thread:$0]  (%p1193_p0), %s1126_s13, 1024, %s1124_s12, %s494_s28  }
 0x2d8 PF: > { %p681_p4 = scmp.ge.s32.totalorder %s889_s22, 2  ;;  %s522_s19 = sand.u32 1, %s861_s15  }
 0x2d9   : > { %p1194_p5 = scmp.ne.s32.totalorder %s1189_s8, 0  ;;  %s523_s23 = scalar_lea.sflag [#allocation4], %s522_s19 }
 0x2db   : > { %p677_p7 = pnand %p681_p4, %p1194_p5 }
 0x2dd   : > { %856 = dma.done.wait (!%p677_p7), %s523_s23, 1024  }
 0x2de   : > { %858 = vsyncadd (!%p677_p7), %s523_s23, 4294966272  ;;  %s20_s22 = sadd.s32 1, %s889_s22   ;;  %s1195_s5 = sld [smem:[#allocation8_spill]] }
 0x2df   : > { %p17_p10 = scmp.ge.s32.totalorder %s20_s22, 10   ;;  %s1196_s15 = smov %s865_s16 }
 0x2e0   : > { %s1197_s16 = smov %s869_s17  ;;  %s1198_s17 = smov %s1002_s10 }
 0x2e1   : > { %s1199_s18 = smov %s881_s20  ;;  %s1200_s19 = smov %s885_s21 }
 0x2e2   : > { %s1201_s20 = smov %s1204_s25  ;;  %19 = sbr.rel (!%p17_p10) target bundleno = 7 (0x7), region = 90 }
 0x2e4   : > { %s1202_s21 = smov %s1195_s5 }
 0x2e9   :  { %528 = vsyncpa [#allocation3], 1 }
 0x2ea   :  { %530 = vsyncpa [#allocation3 + $0x1], 1 }
 0x2eb   :  { %531 = vsyncpa [#allocation4], 1 }
 0x2ec   :  { %533 = vsyncpa [#allocation4 + $0x1], 1 }

</bundles_post_ra>
